<compile_context>
chip_gen: v7x
topology: tpu7x:2x2x1
jax: 0.10.0
libtpu: 0.0.40
codegen_flags: <defaults>
</compile_context>

<pallas_src>
import jax
import jax.numpy as jnp
from jax.experimental import pallas as pl
from jax.experimental.pallas import tpu as pltpu

EPS = 1e-6
LANES = 128
SUBLANES = 8


def _num_tensorcores():
    """Best-effort TensorCore count (2 on v7x, 1 on v5e/v6e). Falls back safely to 1."""
    try:
        info = pltpu.get_tpu_info()
    except Exception:
        return 1
    for attr in ("num_cores", "core_count", "num_tensorcores", "tensorcore_count",
                 "cores_per_chip"):
        v = getattr(info, attr, None)
        if isinstance(v, int) and 1 <= v <= 16:
            return v
    return 1


def _charbonnier_block_sum(x2d, y2d, n_rows, block_rows, n_cores):
    """Sum of sqrt((x-y)^2 + eps) over an (n_rows, 128) slab via Pallas."""
    # Row-block size: multiple of 8, as large as requested, capped to the (rounded-up) slab.
    block_rows = max(SUBLANES, (block_rows // SUBLANES) * SUBLANES)
    rows_up = ((n_rows + SUBLANES - 1) // SUBLANES) * SUBLANES
    tr = min(block_rows, rows_up)

    n_blocks = pl.cdiv(n_rows, tr)
    n_cores = max(1, min(int(n_cores), int(n_blocks)))
    multi = n_cores > 1
    steps = pl.cdiv(n_blocks, n_cores)

    # Static trace-time flags.
    oob_blocks = multi and (n_cores * steps != n_blocks)   # some core owns a past-the-end block
    ragged = (n_rows % tr != 0) or oob_blocks              # any block needs row masking

    # Resident accumulator width: fewer, wider partial sums per step (feedback item 6).
    acc_rows = SUBLANES
    for cand in (64, 32, 16):
        if tr % cand == 0:
            acc_rows = cand
            break

    if multi:
        def in_map(c, s):
            blk = c * steps + s
            if oob_blocks:
                blk = jnp.minimum(blk, n_blocks - 1)       # keep the DMA in bounds
            return (blk, 0)
        out_spec = pl.BlockSpec((None, acc_rows, LANES), lambda c, s: (c, 0, 0))
        out_shape = jax.ShapeDtypeStruct((n_cores, acc_rows, LANES), jnp.float32)
        grid = (n_cores, steps)
        dim_sem = (pltpu.CORE_PARALLEL, pltpu.ARBITRARY)   # real 2-TC split on v7x
        acc_elems = n_cores * acc_rows * LANES
    else:
        def in_map(s):
            return (s, 0)
        out_spec = pl.BlockSpec((acc_rows, LANES), lambda s: (0, 0))
        out_shape = jax.ShapeDtypeStruct((acc_rows, LANES), jnp.float32)
        grid = (steps,)
        dim_sem = (pltpu.ARBITRARY,)
        acc_elems = acc_rows * LANES

    def kernel(x_ref, y_ref, acc_ref):
        if multi:
            c = pl.program_id(0)
            s = pl.program_id(1)
            logical_blk = c * steps + s
        else:
            s = pl.program_id(0)
            logical_blk = s

        @pl.when(s == 0)
        def _init():
            acc_ref[...] = jnp.zeros_like(acc_ref)

        d = x_ref[...].astype(jnp.float32) - y_ref[...].astype(jnp.float32)
        err = jnp.sqrt(d * d + jnp.float32(EPS))

        def accumulate(e):
            # Grouped partial sums: pure VPU vreg adds into the resident accumulator.
            acc_ref[...] += e.reshape(tr // acc_rows, acc_rows, LANES).sum(axis=0)

        if ragged:
            # Unmasked fast path for full blocks; mask only the partial / out-of-range block.
            row_start = logical_blk * tr
            needs_mask = row_start + tr > n_rows

            @pl.when(jnp.logical_not(needs_mask))
            def _full():
                accumulate(err)

            @pl.when(needs_mask)
            def _partial():
                row_ids = jax.lax.broadcasted_iota(jnp.int32, (tr, LANES), 0) + row_start
                # Garbage (possibly NaN) rows past n_rows are selected away before accumulation.
                accumulate(jnp.where(row_ids < n_rows, err, jnp.float32(0.0)))
        else:
            accumulate(err)

    itemsize = int(jnp.dtype(x2d.dtype).itemsize)
    n_elems = int(n_rows) * LANES
    in_buf_bytes = 2 * 2 * tr * LANES * itemsize            # 2 inputs x double buffer
    vmem_limit = int(max(16 * 1024 * 1024, in_buf_bytes + (4 << 20)))
    cost = pl.CostEstimate(
        flops=4 * n_elems,
        transcendentals=n_elems,
        bytes_accessed=2 * n_elems * itemsize + acc_elems * 4,
    )

    partial = pl.pallas_call(
        kernel,
        out_shape=out_shape,
        grid_spec=pltpu.PrefetchScalarGridSpec(
            num_scalar_prefetch=0,
            grid=grid,
            in_specs=[
                pl.BlockSpec((tr, LANES), in_map),
                pl.BlockSpec((tr, LANES), in_map),
            ],
            out_specs=out_spec,
        ),
        compiler_params=pltpu.CompilerParams(
            dimension_semantics=dim_sem,
            vmem_limit_bytes=vmem_limit,
            allow_input_fusion=[True, True],
        ),
        cost_estimate=cost,
    )(x2d, y2d)
    return jnp.sum(partial)


def l1_charbonnier_loss(x, y, *, block_rows=8192):
    """Mean over all elements of sqrt((x - y)^2 + 1e-6). Matches the PyTorch module."""
    assert x.shape == y.shape
    n_total = x.size

    xf = jnp.ravel(x)          # metadata-only for contiguous inputs; keep native dtype
    yf = jnp.ravel(y)

    n_rows = n_total // LANES
    n_main = n_rows * LANES

    total = jnp.float32(0.0)

    # < 128-element lane tail: tiny, handled in plain JAX.
    if n_main < n_total:
        tx = jax.lax.slice(xf, (n_main,), (n_total,)).astype(jnp.float32)
        ty = jax.lax.slice(yf, (n_main,), (n_total,)).astype(jnp.float32)
        td = tx - ty
        total = total + jnp.sum(jnp.sqrt(td * td + jnp.float32(EPS)))

    if n_rows > 0:
        if n_main < n_total:
            # allow_input_fusion on the pallas_call lets XLA fuse this slice into the kernel's
            # inputs instead of materializing a near-full HBM copy of x and y.
            xm = jax.lax.slice(xf, (0,), (n_main,))
            ym = jax.lax.slice(yf, (0,), (n_main,))
        else:
            xm, ym = xf, yf
        x2d = xm.reshape(n_rows, LANES)
        y2d = ym.reshape(n_rows, LANES)
        total = total + _charbonnier_block_sum(x2d, y2d, n_rows, block_rows,
                                               _num_tensorcores())

    return total / jnp.float32(n_total)


if __name__ == "__main__":
    key = jax.random.PRNGKey(0)
    kx, ky = jax.random.split(key)

    # 1) Small NCHW tensors like the PyTorch module would see (clean multiple of 128).
    shape = (2, 4, 16, 16)
    X = jax.random.normal(kx, shape, dtype=jnp.float32)
    Y = jax.random.normal(ky, shape, dtype=jnp.float32)
    loss = jax.block_until_ready(l1_charbonnier_loss(X, Y))
    diff = X - Y
    ref = jnp.mean(jnp.sqrt(diff * diff + EPS))
    assert jnp.allclose(loss, ref, rtol=1e-5, atol=1e-6), (loss, ref)

    # 2) Awkward size: partial 128-lane row block in-kernel + a 91-element lane tail in JAX.
    shape2 = (3, 5, 9, 13)   # 1755 elements: 13 full rows of 128 + 91-element tail
    X2 = jax.random.normal(kx, shape2, dtype=jnp.float32)
    Y2 = jax.random.normal(ky, shape2, dtype=jnp.float32)
    loss2 = jax.block_until_ready(l1_charbonnier_loss(X2, Y2))
    d2 = X2 - Y2
    ref2 = jnp.mean(jnp.sqrt(d2 * d2 + EPS))
    assert jnp.allclose(loss2, ref2, rtol=1e-5, atol=1e-6), (loss2, ref2)

    # 3) Multi-step grid with a ragged last row block (exercises the gated mask fast path).
    shape3 = (8, 8, 64, 64)  # 262144 elements = 2048 rows of 128
    X3 = jax.random.normal(kx, shape3, dtype=jnp.float32)
    Y3 = jax.random.normal(ky, shape3, dtype=jnp.float32)
    loss3 = jax.block_until_ready(l1_charbonnier_loss(X3, Y3, block_rows=768))
    d3 = X3 - Y3
    ref3 = jnp.mean(jnp.sqrt(d3 * d3 + EPS))
    assert jnp.allclose(loss3, ref3, rtol=1e-4, atol=1e-5), (loss3, ref3)

    # 4) Native-bf16 streaming with on-chip f32 accumulation.
    Xb = X.astype(jnp.bfloat16)
    Yb = Y.astype(jnp.bfloat16)
    loss4 = jax.block_until_ready(l1_charbonnier_loss(Xb, Yb))
    db = Xb.astype(jnp.float32) - Yb.astype(jnp.float32)
    ref4 = jnp.mean(jnp.sqrt(db * db + EPS))
    assert jnp.allclose(loss4, ref4, rtol=1e-3, atol=1e-4), (loss4, ref4)

    print("KERNEL_OK")
</pallas_src>

<mosaic_0001>
module attributes {stable_mosaic.version = 11 : i64} {
  func.func @kernel(%arg0: i32, %arg1: memref<16x128xf32, #tpu.memory_space<vmem>>, %arg2: memref<16x128xf32, #tpu.memory_space<vmem>>, %arg3: memref<16x128xf32, #tpu.memory_space<vmem>>) attributes {dimension_semantics = [#tpu.dimension_semantics<arbitrary>], iteration_bounds = array<i64: 1>, scalar_prefetch = 0 : i64, scratch_operands = 0 : i64, tpu.core_type = #tpu.core_type<tc>, window_params = [{transform_indices = @transform_0, window_bounds = array<i64: 16, 128>}, {transform_indices = @transform_1, window_bounds = array<i64: 16, 128>}, {pipeline_mode = #tpu.pipeline_mode<synchronous>, transform_indices = @transform_2, window_bounds = array<i64: 16, 128>}]} {
    %c0_i32 = arith.constant 0 : i32
    %0 = arith.cmpi eq, %arg0, %c0_i32 : i32
    %1 = arith.extui %0 : i1 to i32
    %c0_i32_0 = arith.constant 0 : i32
    %2 = arith.cmpi ne, %1, %c0_i32_0 : i32
    scf.if %2 {
      %cst_9 = arith.constant 0.000000e+00 : f32
      %15 = vector.broadcast %cst_9 : f32 to vector<16x128xf32>
      %c0_10 = arith.constant 0 : index
      %c0_11 = arith.constant 0 : index
      %16 = vector.load %arg3[%c0_10, %c0_11] : memref<16x128xf32, #tpu.memory_space<vmem>>, vector<16x128xf32>
      tpu.vector_store %arg3[%c0_10, %c0_11], %15 {strides = array<i32>} : memref<16x128xf32, #tpu.memory_space<vmem>>, vector<16x128xf32>,
    } else {
    }
    %c0 = arith.constant 0 : index
    %c0_1 = arith.constant 0 : index
    %3 = vector.load %arg1[%c0, %c0_1] : memref<16x128xf32, #tpu.memory_space<vmem>>, vector<16x128xf32>
    %c0_2 = arith.constant 0 : index
    %c0_3 = arith.constant 0 : index
    %4 = vector.load %arg2[%c0_2, %c0_3] : memref<16x128xf32, #tpu.memory_space<vmem>>, vector<16x128xf32>
    %5 = arith.subf %3, %4 : vector<16x128xf32>
    %6 = arith.mulf %5, %5 : vector<16x128xf32>
    %cst = arith.constant 9.99999997E-7 : f32
    %7 = vector.broadcast %cst : f32 to vector<16x128xf32>
    %8 = arith.addf %6, %7 : vector<16x128xf32>
    %9 = math.sqrt %8 : vector<16x128xf32>
    %c0_4 = arith.constant 0 : index
    %c0_5 = arith.constant 0 : index
    %10 = vector.load %arg3[%c0_4, %c0_5] : memref<16x128xf32, #tpu.memory_space<vmem>>, vector<16x128xf32>
    %11 = vector.shape_cast %9 : vector<16x128xf32> to vector<1x16x128xf32>
    %cst_6 = arith.constant dense<0.000000e+00> : vector<16x128xf32>
    %12 = vector.multi_reduction <add>, %11, %cst_6 [0] : vector<1x16x128xf32> to vector<16x128xf32>
    %13 = arith.addf %10, %12 : vector<16x128xf32>
    %c0_7 = arith.constant 0 : index
    %c0_8 = arith.constant 0 : index
    %14 = vector.load %arg3[%c0_7, %c0_8] : memref<16x128xf32, #tpu.memory_space<vmem>>, vector<16x128xf32>
    tpu.vector_store %arg3[%c0_7, %c0_8], %13 {strides = array<i32>} : memref<16x128xf32, #tpu.memory_space<vmem>>, vector<16x128xf32>,
    return
  }
  func.func @transform_0(%arg0: i32) -> (i32, i32) {
    %c0_i32 = arith.constant 0 : i32
    %c0_i32_0 = arith.constant 0 : i32
    return %arg0, %c0_i32 : i32, i32
  }
  func.func @transform_1(%arg0: i32) -> (i32, i32) {
    %c0_i32 = arith.constant 0 : i32
    %c0_i32_0 = arith.constant 0 : i32
    return %arg0, %c0_i32 : i32, i32
  }
  func.func @transform_2(%arg0: i32) -> (i32, i32) {
    %c0_i32 = arith.constant 0 : i32
    %c0_i32_0 = arith.constant 0 : i32
    %c0_i32_1 = arith.constant 0 : i32
    return %c0_i32, %c0_i32_0 : i32, i32
  }
}

</mosaic_0001>

<bundles_post_ra>
// kernel: tpu_custom_call.1
= control target key start
LH: loop header
LB: loop body
LE: loop exit
PB: predicated region body
PF: predicated region fallthrough
CT: control target
= control target key end

     0   :  { %7 = vsyncpa [#allocation3], 0  ;;  %s243_s0 = inlined_call_operand.hbm [shape: f32[16,128], index: 0, kind: input, shape index: {}]   ;;  %s244_s1 = inlined_call_operand.hbm [shape: f32[16,128], index: 1, kind: input, shape index: {}]   ;;  %s245_s2 = inlined_call_operand.hbm [shape: f32[16,128], index: 2, kind: output, shape index: {}]  }
   0x1   :  { %8 = vsyncpa [#allocation6], 0 }
   0x2   :  { %9 = vsyncpa [#allocation4], 0  ;;  %s178_s9 = smov [#allocation2]   ;;  %s106_s13 = scalar_lea.hbm %s243_s0, 256 }
   0x3   :  { %s15_s10 = sshll.u32 %s178_s9, 4  ;;  %p107_p0 = scmp.ne.s32.totalorder %s243_s0, %s106_s13  ;;  %s16_s10 = int_to_ptr.vmem [resolvable:$true] %s15_s10 }
   0x4   :  { %p110_p1 = scmp.lt.u32.totalorder %s106_s13, %s243_s0 }
   0x6   :  { %p112_p2 = pnand %p110_p1, %p107_p0 }
   0x8   :  { %115 = shalt.err (!%p112_p2)
}
   0x9   :  { %s116_s18 = scalar_lea.vmem %s16_s10, 256  ;;  %p121_p4 = scmp.lt.s32.totalorder %s16_s10, %s16_s10 }
   0xa   :  { %p117_p3 = scmp.ne.s32.totalorder %s16_s10, %s116_s18  ;;  %p122_p5 = scmp.lt.s32.totalorder %s116_s18, %s116_s18 }
   0xc   :  { %p123_p6 = por %p122_p5, %p121_p4 }
   0xe   :  { %p124_p7 = pnand %p123_p6, %p117_p3 }
  0x10   :  { %127 = shalt.err (!%p124_p7)
}
  0x11   :  { %s179_s19 = smov 128   ;;  %s180_s20 = smov 8  }
  0x12   :  { %21 = dma.hbm_to_vmem [thread:$0]  %s243_s0, 256, %s16_s10, [#allocation3], %s179_s19, %s179_s19, %s180_s20  }
  0x13   :  { %s181_s23 = smov [#allocation5]   ;;  %s128_s27 = scalar_lea.hbm %s244_s1, 256 }
  0x14   :  { %s27_s24 = sshll.u32 %s181_s23, 4  ;;  %p129_p8 = scmp.ne.s32.totalorder %s244_s1, %s128_s27  ;;  %s28_s24 = int_to_ptr.vmem [resolvable:$true] %s27_s24 }
  0x15   :  { %p132_p9 = scmp.lt.u32.totalorder %s128_s27, %s244_s1 }
  0x17   :  { %p134_p10 = pnand %p132_p9, %p129_p8 }
  0x19   :  { %137 = shalt.err (!%p134_p10)
}
  0x1a   :  { %s138_s4 = scalar_lea.vmem %s28_s24, 256  ;;  %p143_p12 = scmp.lt.s32.totalorder %s28_s24, %s28_s24 }
  0x1b   :  { %p139_p11 = scmp.ne.s32.totalorder %s28_s24, %s138_s4  ;;  %p144_p13 = scmp.lt.s32.totalorder %s138_s4, %s138_s4 }
  0x1d   :  { %p145_p0 = por %p144_p13, %p143_p12 }
  0x1f   :  { %p146_p1 = pnand %p145_p0, %p139_p11 }
  0x21   :  { %149 = shalt.err (!%p146_p1)
}
  0x22   :  { %33 = dma.hbm_to_vmem [thread:$0]  %s244_s1, 256, %s28_s24, [#allocation6], %s179_s19, %s179_s19, %s180_s20  }
  0x23   :  { %172 = dma.done.wait [#allocation3], 256  }
  0x24   :  { %173 = vsyncadd [#allocation3], 4294967040 }
  0x25   :  { %174 = dma.done.wait [#allocation6], 256  }
  0x26   :  { %175 = vsyncadd [#allocation6], 4294967040  ;;  %v46_v0 = vld [vmem:[#allocation2] sm:$0xff]  ;;  %v48_v1 = vld [vmem:[#allocation5] sm:$0xff]  ;;  %s182_s1 = smov [#allocation7]  }
  0x27   :  { %v47_v2 = vld [vmem:[#allocation2 + $0x8] sm:$0xff]  ;;  %v50_v3 = vsub.f32 %v46_v0, %v48_v1  ;;  %v49_v4 = vld [vmem:[#allocation5 + $0x8] sm:$0xff]  ;;  %s83_s6 = sshll.u32 %s182_s1, 4  ;;  %s84_s6 = int_to_ptr.vmem [resolvable:$true] %s83_s6 }
  0x28   :  { %v51_v5 = vsub.f32 %v47_v2, %v49_v4  ;;  %s150_s7 = scalar_lea.vmem %s84_s6, 256  ;;  %p155_p3 = scmp.lt.s32.totalorder %s84_s6, %s84_s6 }
  0x29   :  { %v52_v6 = vmul.f32 %v50_v3, %v50_v3  ;;  %p151_p2 = scmp.ne.s32.totalorder %s84_s6, %s150_s7  ;;  %p156_p4 = scmp.lt.s32.totalorder %s150_s7, %s150_s7 }
  0x2a   :  { %v53_v7 = vmul.f32 %v51_v5, %v51_v5 }
  0x2b   :  { %v54_v8 = vadd.f32 1e-06, %v52_v6  ;;  %p157_p5 = por %p156_p4, %p155_p3 }
  0x2c   :  { %v55_v9 = vadd.f32 1e-06, %v53_v7 }
  0x2d   :  { %102 = vrsqrt.f32 %v54_v8  ;;  %vm58_vm0 = vcmp.eq.f32.partialorder %v54_v8, inf  ;;  %v61_v11 = vand.u32 2147483648, %v54_v8  ;;  %vm60_vm1 = vcmp.eq.f32.partialorder %v54_v8, 0.0  ;;  %p158_p6 = pnand %p157_p5, %p151_p2 }
  0x2e   :  { %104 = vrsqrt.f32 %v55_v9  ;;  %vm65_vm2 = vcmp.eq.f32.partialorder %v55_v9, inf  ;;  %v68_v14 = vand.u32 2147483648, %v55_v9  ;;  %vm67_vm3 = vcmp.eq.f32.partialorder %v55_v9, 0.0 }
  0x37   :  { %v103_v10 = vpop.eup %102 }
  0x38   :  { %v105_v12 = vpop.eup %104  ;;  %v57_v13 = vmul.f32 %v103_v10, %v54_v8 }
  0x39   :  { %v64_v15 = vmul.f32 %v105_v12, %v55_v9 }
  0x3a   :  { %v59_v16 = vsel %vm58_vm0, %v54_v8, %v57_v13 }
  0x3b   :  { %v62_v17 = vsel %vm60_vm1, %v61_v11, %v59_v16  ;;  %v66_v18 = vsel %vm65_vm2, %v55_v9, %v64_v15 }
  0x3c   :  { %v69_v19 = vsel %vm67_vm3, %v68_v14, %v66_v18  ;;  %76 = vst [vmem:[#allocation7] sm:$0xff] %v62_v17 }
  0x3d   :  { %77 = vst [vmem:[#allocation7 + $0x8] sm:$0xff] %v69_v19 }
  0x3e   :  { %161 = shalt.err (!%p158_p6)
}
  0x3f   :  { %s162_s10 = scalar_lea.hbm %s245_s2, 256 }
  0x40   :  { %p163_p7 = scmp.ne.s32.totalorder %s245_s2, %s162_s10  ;;  %p166_p8 = scmp.lt.u32.totalorder %s162_s10, %s245_s2 }
  0x42   :  { %p168_p9 = pnand %p166_p8, %p163_p7 }
  0x44   :  { %171 = shalt.err (!%p168_p9)
}
  0x45   :  { %89 = dma.vmem_to_hbm [thread:$0]  %s84_s6, 256, %s245_s2, [#allocation4], %s179_s19, %s179_s19, %s180_s20  }
  0x46   :  { %176 = dma.done.wait [#allocation4], 256  }
  0x47   :  { %177 = vsyncadd [#allocation4], 4294967040 }
  0x48   :  { %93 = vsyncpa [#allocation3], 1 }
  0x49   :  { %94 = vsyncpa [#allocation6], 1 }
  0x4a   :  { %95 = vsyncpa [#allocation4], 1 }

</bundles_post_ra>
